<compile_context>
chip_gen: v7x
topology: tpu7x:2x2x1
jax: 0.10.0
libtpu: 0.0.40
codegen_flags: <defaults>
</compile_context>

<pallas_src>
import functools

import jax
import jax.numpy as jnp
from jax.experimental import pallas as pl
from jax.experimental.pallas import tpu as pltpu


def _round_up(n, m):
    return ((n + m - 1) // m) * m


def _silu(z):
    return z * jax.nn.sigmoid(z)


def _residual_block_kernel(x_ref, t_ref,
                           w1s_ref, b1s_ref,   # block1 (+ packed shortcut): [K1, wcols], [1, wcols]
                           wt_ref, bt_ref,     # time mlp linear:            [T, Cout_p], [1, Cout_p]
                           w2_ref, b2_ref,     # block2 linear:              [Cout_p, Cout_p], [1, Cout_p]
                           o_ref, *, cout_p, identity_shortcut):
    f32 = jnp.float32
    x = x_ref[...]

    # One MXU pass over x.  Non-identity case: packed [block1 | shortcut] weights.
    y = jnp.dot(x, w1s_ref[...], preferred_element_type=f32) + b1s_ref[...].astype(f32)
    if identity_shortcut:
        h = _silu(y)                    # block1: SiLU (Dropout = identity in eval mode)
        sc = x.astype(f32)              # shortcut(x) = x  (x block already has width cout_p)
    else:
        # cout_p is a multiple of 128 -> both slices are (8,128)-tile aligned (free).
        h = _silu(y[:, :cout_p])        # block1
        sc = y[:, cout_p:]              # shortcut(x)

    # time_emb = Linear(SiLU(t))
    t_act = _silu(t_ref[...].astype(f32))
    temb = jnp.dot(t_act.astype(wt_ref.dtype), wt_ref[...],
                   preferred_element_type=f32) + bt_ref[...].astype(f32)
    h = h + temb

    # block2: SiLU(Linear(h)) (Dropout = identity in eval mode)
    h = jnp.dot(h.astype(w2_ref.dtype), w2_ref[...],
                preferred_element_type=f32) + b2_ref[...].astype(f32)
    h = _silu(h)

    o_ref[...] = (h + sc).astype(o_ref.dtype)


def residual_block(x, t, params, *, tb=None, interpret=False):
    """x: [B, Cin], t: [B, T] -> [B, Cout]  (eval-mode forward of ResidualBlock)."""
    B, Cin = x.shape
    Bt, T = t.shape
    assert Bt == B, "x and t must share the batch dimension"

    w1, b1 = params["w1"], params["b1"]
    wt, bt = params["wt"], params["bt"]
    w2, b2 = params["w2"], params["b2"]
    Cout = w1.shape[1]
    ws = params.get("ws")
    bs = params.get("bs")
    identity_shortcut = ws is None      # nn.Identity shortcut (in_channels == out_channels)
    if identity_shortcut:
        assert Cin == Cout, "Identity shortcut requires in_channels == out_channels"

    # Only the output / N dim is padded to a lane-dense multiple of 128.
    Cout_p = _round_up(Cout, 128)
    assert Cout_p % 128 == 0            # keeps the block1/shortcut split tile-aligned

    def pad_cols(a, cols):
        return jnp.pad(a, ((0, 0), (0, cols - a.shape[1])))

    if identity_shortcut:
        # sc = x inside the kernel.  If Cout is not 128-aligned, pad x's feature dim
        # to Cout_p (cheap, <128 extra lanes; only this unaligned-identity corner case)
        # so the residual add stays lane-dense.  Aligned case: x used as-is, no pad.
        K1 = Cout_p if Cout_p != Cout else Cin
        x_in = x if K1 == Cin else pad_cols(x, K1)
        w1s = jnp.pad(w1, ((0, K1 - Cin), (0, Cout_p - Cout)))
        b1s = pad_cols(b1, Cout_p)
        wcols = Cout_p
    else:
        if bs is None:
            bs = jnp.zeros((1, Cout), dtype=w1.dtype)
        # Pack [w1 | ws] / [b1 | bs] so block1 and shortcut share one MXU pass over x.
        K1 = Cin
        x_in = x
        w1s = jnp.concatenate([pad_cols(w1, Cout_p), pad_cols(ws, Cout_p)], axis=1)
        b1s = jnp.concatenate([pad_cols(b1, Cout_p), pad_cols(bs, Cout_p)], axis=1)
        wcols = 2 * Cout_p

    wt_p = pad_cols(wt, Cout_p)                                     # [T, Cout_p]
    bt_p = pad_cols(bt, Cout_p)
    w2_p = jnp.pad(w2, ((0, Cout_p - Cout), (0, Cout_p - Cout)))    # [Cout_p, Cout_p]
    b2_p = pad_cols(b2, Cout_p)

    # --- batch tiling: no host-side batch padding; Pallas handles the ragged tail ---
    row_align = 16 if x.dtype == jnp.bfloat16 else 8
    if tb is None:
        # >= 2 grid steps when possible (v7x dual TensorCore), up to 512 rows/step.
        half = -(-B // 2)
        tb = min(512, max(row_align, _round_up(half, row_align)))
    else:
        assert tb % row_align == 0, "tb must be a multiple of 8 (f32) / 16 (bf16)"
    grid = (pl.cdiv(B, tb),)

    # --- explicit VMEM budget for the actual (double-buffered) footprint ---
    a_item = jnp.dtype(x.dtype).itemsize
    w_item = jnp.dtype(w1.dtype).itemsize
    weight_bytes = (K1 * wcols + T * Cout_p + Cout_p * Cout_p
                    + wcols + 3 * Cout_p) * w_item
    act_bytes = tb * (K1 + T + Cout_p) * a_item                     # x / t / out tiles
    scratch_bytes = tb * (wcols + 2 * Cout_p) * 4                   # f32 intermediates
    est = 2 * weight_bytes + 2 * act_bytes + scratch_bytes          # 2x = double buffering
    vmem_limit = max(32 << 20, min(int(1.5 * est) + (4 << 20), 48 << 20))

    kernel = functools.partial(_residual_block_kernel, cout_p=Cout_p,
                               identity_shortcut=identity_shortcut)
    out_shape = jax.ShapeDtypeStruct((B, Cout_p), x.dtype)

    # Weights/biases never change across the batch grid -> constant index_map
    # (Pallas does not re-DMA a block whose index is unchanged between steps).
    wspec = lambda shape: pl.BlockSpec(shape, lambda i: (0, 0))

    out = pl.pallas_call(
        kernel,
        out_shape=out_shape,
        grid_spec=pltpu.PrefetchScalarGridSpec(
            num_scalar_prefetch=0,
            grid=grid,
            in_specs=[
                pl.BlockSpec((tb, K1), lambda i: (i, 0)),           # x tile (true feature width)
                pl.BlockSpec((tb, T), lambda i: (i, 0)),            # t tile (true feature width)
                wspec((K1, wcols)), wspec((1, wcols)),              # w1 (| ws), b1 (| bs)
                wspec((T, Cout_p)), wspec((1, Cout_p)),             # wt, bt
                wspec((Cout_p, Cout_p)), wspec((1, Cout_p)),        # w2, b2
            ],
            out_specs=pl.BlockSpec((tb, Cout_p), lambda i: (i, 0)),
        ),
        compiler_params=pltpu.CompilerParams(
            dimension_semantics=("parallel",),
            vmem_limit_bytes=vmem_limit),
        interpret=interpret,
    )(x_in, t, w1s, b1s, wt_p, bt_p, w2_p, b2_p)

    return out if Cout_p == Cout else out[:, :Cout]


def reference(x, t, params):
    h = _silu(x @ params["w1"] + params["b1"])
    temb = _silu(t) @ params["wt"] + params["bt"]
    h = h + temb
    h = _silu(h @ params["w2"] + params["b2"])
    ws = params.get("ws")
    sc = x if ws is None else x @ ws + params["bs"]
    return h + sc


if __name__ == "__main__":
    key = jax.random.PRNGKey(0)
    B, Cin, Cout, T = 8, 16, 32, 8

    keys = jax.random.split(key, 12)
    scale = 0.1
    params = {
        "w1": scale * jax.random.normal(keys[0], (Cin, Cout), jnp.float32),
        "b1": scale * jax.random.normal(keys[1], (1, Cout), jnp.float32),
        "wt": scale * jax.random.normal(keys[2], (T, Cout), jnp.float32),
        "bt": scale * jax.random.normal(keys[3], (1, Cout), jnp.float32),
        "w2": scale * jax.random.normal(keys[4], (Cout, Cout), jnp.float32),
        "b2": scale * jax.random.normal(keys[5], (1, Cout), jnp.float32),
        "ws": scale * jax.random.normal(keys[6], (Cin, Cout), jnp.float32),
        "bs": scale * jax.random.normal(keys[7], (1, Cout), jnp.float32),
    }
    x = jax.random.normal(keys[8], (B, Cin), jnp.float32)
    t = jax.random.normal(keys[9], (B, T), jnp.float32)

    # Linear-shortcut path (in_channels != out_channels).
    out = jax.block_until_ready(residual_block(x, t, params))
    ref = reference(x, t, params)
    assert out.shape == (B, Cout)
    assert jnp.allclose(out, ref, atol=2e-5, rtol=2e-5), "mismatch vs reference (linear shortcut)"

    # Identity-shortcut path (in_channels == out_channels).
    params_id = {
        "w1": scale * jax.random.normal(keys[10], (Cout, Cout), jnp.float32),
        "b1": params["b1"],
        "wt": params["wt"], "bt": params["bt"],
        "w2": params["w2"], "b2": params["b2"],
    }
    x_id = jax.random.normal(keys[11], (B, Cout), jnp.float32)
    out_id = jax.block_until_ready(residual_block(x_id, t, params_id))
    ref_id = reference(x_id, t, params_id)
    assert out_id.shape == (B, Cout)
    assert jnp.allclose(out_id, ref_id, atol=2e-5, rtol=2e-5), "mismatch vs reference (identity shortcut)"

    print("KERNEL_OK")
</pallas_src>

<mosaic_0001>
module attributes {stable_mosaic.version = 11 : i64} {
  func.func @_residual_block_kernel(%arg0: i32, %arg1: memref<8x16xf32, #tpu.memory_space<vmem>>, %arg2: memref<8x8xf32, #tpu.memory_space<vmem>>, %arg3: memref<16x256xf32, #tpu.memory_space<vmem>>, %arg4: memref<1x256xf32, #tpu.memory_space<vmem>>, %arg5: memref<8x128xf32, #tpu.memory_space<vmem>>, %arg6: memref<1x128xf32, #tpu.memory_space<vmem>>, %arg7: memref<128x128xf32, #tpu.memory_space<vmem>>, %arg8: memref<1x128xf32, #tpu.memory_space<vmem>>, %arg9: memref<8x128xf32, #tpu.memory_space<vmem>>) attributes {dimension_semantics = [#tpu.dimension_semantics<parallel>], iteration_bounds = array<i64: 1>, scalar_prefetch = 0 : i64, scratch_operands = 0 : i64, tpu.core_type = #tpu.core_type<tc>, window_params = [{transform_indices = @transform_0, window_bounds = array<i64: 8, 16>}, {transform_indices = @transform_1, window_bounds = array<i64: 8, 8>}, {pipeline_mode = #tpu.pipeline_mode<synchronous>, transform_indices = @transform_2, window_bounds = array<i64: 16, 256>}, {pipeline_mode = #tpu.pipeline_mode<synchronous>, transform_indices = @transform_3, window_bounds = array<i64: 1, 256>}, {pipeline_mode = #tpu.pipeline_mode<synchronous>, transform_indices = @transform_4, window_bounds = array<i64: 8, 128>}, {pipeline_mode = #tpu.pipeline_mode<synchronous>, transform_indices = @transform_5, window_bounds = array<i64: 1, 128>}, {pipeline_mode = #tpu.pipeline_mode<synchronous>, transform_indices = @transform_6, window_bounds = array<i64: 128, 128>}, {pipeline_mode = #tpu.pipeline_mode<synchronous>, transform_indices = @transform_7, window_bounds = array<i64: 1, 128>}, {transform_indices = @transform_8, window_bounds = array<i64: 8, 128>}]} {
    %c0 = arith.constant 0 : index
    %c0_0 = arith.constant 0 : index
    %0 = vector.load %arg1[%c0, %c0_0] : memref<8x16xf32, #tpu.memory_space<vmem>>, vector<8x16xf32>
    %c0_1 = arith.constant 0 : index
    %c0_2 = arith.constant 0 : index
    %1 = vector.load %arg3[%c0_1, %c0_2] : memref<16x256xf32, #tpu.memory_space<vmem>>, vector<16x256xf32>
    %cst = arith.constant dense<0.000000e+00> : vector<8x256xf32>
    %2 = tpu.matmul %0, %1, %cst {dimension_numbers = #tpu.dot_dimension_numbers<[1], [0], [0], [1], [0, 0, 1, 1], [], []>} : vector<8x16xf32>, vector<16x256xf32>, vector<8x256xf32> -> vector<8x256xf32>
    %c0_3 = arith.constant 0 : index
    %c0_4 = arith.constant 0 : index
    %3 = vector.load %arg4[%c0_3, %c0_4] : memref<1x256xf32, #tpu.memory_space<vmem>>, vector<1x256xf32>
    %4 = vector.broadcast %3 : vector<1x256xf32> to vector<8x256xf32>
    %5 = arith.addf %2, %4 : vector<8x256xf32>
    %6 = vector.extract_strided_slice %5 {offsets = [0, 0], sizes = [8, 128], strides = [1, 1]} : vector<8x256xf32> to vector<8x128xf32>
    %7 = arith.negf %6 : vector<8x128xf32>
    %8 = math.exp %7 : vector<8x128xf32>
    %cst_5 = arith.constant 1.000000e+00 : f32
    %9 = vector.broadcast %cst_5 : f32 to vector<8x128xf32>
    %10 = arith.addf %9, %8 : vector<8x128xf32>
    %11 = arith.divf %9, %10 : vector<8x128xf32>
    %12 = arith.mulf %6, %11 : vector<8x128xf32>
    %13 = vector.extract_strided_slice %5 {offsets = [0, 128], sizes = [8, 128], strides = [1, 1]} : vector<8x256xf32> to vector<8x128xf32>
    %c0_6 = arith.constant 0 : index
    %c0_7 = arith.constant 0 : index
    %14 = vector.load %arg2[%c0_6, %c0_7] : memref<8x8xf32, #tpu.memory_space<vmem>>, vector<8x8xf32>
    %15 = arith.negf %14 : vector<8x8xf32>
    %16 = math.exp %15 : vector<8x8xf32>
    %cst_8 = arith.constant 1.000000e+00 : f32
    %17 = vector.broadcast %cst_8 : f32 to vector<8x8xf32>
    %18 = arith.addf %17, %16 : vector<8x8xf32>
    %19 = arith.divf %17, %18 : vector<8x8xf32>
    %20 = arith.mulf %14, %19 : vector<8x8xf32>
    %c0_9 = arith.constant 0 : index
    %c0_10 = arith.constant 0 : index
    %21 = vector.load %arg5[%c0_9, %c0_10] : memref<8x128xf32, #tpu.memory_space<vmem>>, vector<8x128xf32>
    %cst_11 = arith.constant dense<0.000000e+00> : vector<8x128xf32>
    %22 = tpu.matmul %20, %21, %cst_11 {dimension_numbers = #tpu.dot_dimension_numbers<[1], [0], [0], [1], [0, 0, 1, 1], [], []>} : vector<8x8xf32>, vector<8x128xf32>, vector<8x128xf32> -> vector<8x128xf32>
    %c0_12 = arith.constant 0 : index
    %c0_13 = arith.constant 0 : index
    %23 = vector.load %arg6[%c0_12, %c0_13] : memref<1x128xf32, #tpu.memory_space<vmem>>, vector<1x128xf32>
    %24 = vector.broadcast %23 : vector<1x128xf32> to vector<8x128xf32>
    %25 = arith.addf %22, %24 : vector<8x128xf32>
    %26 = arith.addf %12, %25 : vector<8x128xf32>
    %c0_14 = arith.constant 0 : index
    %c0_15 = arith.constant 0 : index
    %27 = vector.load %arg7[%c0_14, %c0_15] : memref<128x128xf32, #tpu.memory_space<vmem>>, vector<128x128xf32>
    %cst_16 = arith.constant dense<0.000000e+00> : vector<8x128xf32>
    %28 = tpu.matmul %26, %27, %cst_16 {dimension_numbers = #tpu.dot_dimension_numbers<[1], [0], [0], [1], [0, 0, 1, 1], [], []>} : vector<8x128xf32>, vector<128x128xf32>, vector<8x128xf32> -> vector<8x128xf32>
    %c0_17 = arith.constant 0 : index
    %c0_18 = arith.constant 0 : index
    %29 = vector.load %arg8[%c0_17, %c0_18] : memref<1x128xf32, #tpu.memory_space<vmem>>, vector<1x128xf32>
    %30 = vector.broadcast %29 : vector<1x128xf32> to vector<8x128xf32>
    %31 = arith.addf %28, %30 : vector<8x128xf32>
    %32 = arith.negf %31 : vector<8x128xf32>
    %33 = math.exp %32 : vector<8x128xf32>
    %cst_19 = arith.constant 1.000000e+00 : f32
    %34 = vector.broadcast %cst_19 : f32 to vector<8x128xf32>
    %35 = arith.addf %34, %33 : vector<8x128xf32>
    %36 = arith.divf %34, %35 : vector<8x128xf32>
    %37 = arith.mulf %31, %36 : vector<8x128xf32>
    %38 = arith.addf %37, %13 : vector<8x128xf32>
    %c0_20 = arith.constant 0 : index
    %c0_21 = arith.constant 0 : index
    %39 = vector.load %arg9[%c0_20, %c0_21] : memref<8x128xf32, #tpu.memory_space<vmem>>, vector<8x128xf32>
    tpu.vector_store %arg9[%c0_20, %c0_21], %38 {strides = array<i32>} : memref<8x128xf32, #tpu.memory_space<vmem>>, vector<8x128xf32>,
    return
  }
  func.func @transform_0(%arg0: i32) -> (i32, i32) {
    %c0_i32 = arith.constant 0 : i32
    %c0_i32_0 = arith.constant 0 : i32
    return %arg0, %c0_i32 : i32, i32
  }
  func.func @transform_1(%arg0: i32) -> (i32, i32) {
    %c0_i32 = arith.constant 0 : i32
    %c0_i32_0 = arith.constant 0 : i32
    return %arg0, %c0_i32 : i32, i32
  }
  func.func @transform_2(%arg0: i32) -> (i32, i32) {
    %c0_i32 = arith.constant 0 : i32
    %c0_i32_0 = arith.constant 0 : i32
    %c0_i32_1 = arith.constant 0 : i32
    return %c0_i32, %c0_i32_0 : i32, i32
  }
  func.func @transform_3(%arg0: i32) -> (i32, i32) {
    %c0_i32 = arith.constant 0 : i32
    %c0_i32_0 = arith.constant 0 : i32
    %c0_i32_1 = arith.constant 0 : i32
    return %c0_i32, %c0_i32_0 : i32, i32
  }
  func.func @transform_4(%arg0: i32) -> (i32, i32) {
    %c0_i32 = arith.constant 0 : i32
    %c0_i32_0 = arith.constant 0 : i32
    %c0_i32_1 = arith.constant 0 : i32
    return %c0_i32, %c0_i32_0 : i32, i32
  }
  func.func @transform_5(%arg0: i32) -> (i32, i32) {
    %c0_i32 = arith.constant 0 : i32
    %c0_i32_0 = arith.constant 0 : i32
    %c0_i32_1 = arith.constant 0 : i32
    return %c0_i32, %c0_i32_0 : i32, i32
  }
  func.func @transform_6(%arg0: i32) -> (i32, i32) {
    %c0_i32 = arith.constant 0 : i32
    %c0_i32_0 = arith.constant 0 : i32
    %c0_i32_1 = arith.constant 0 : i32
    return %c0_i32, %c0_i32_0 : i32, i32
  }
  func.func @transform_7(%arg0: i32) -> (i32, i32) {
    %c0_i32 = arith.constant 0 : i32
    %c0_i32_0 = arith.constant 0 : i32
    %c0_i32_1 = arith.constant 0 : i32
    return %c0_i32, %c0_i32_0 : i32, i32
  }
  func.func @transform_8(%arg0: i32) -> (i32, i32) {
    %c0_i32 = arith.constant 0 : i32
    %c0_i32_0 = arith.constant 0 : i32
    return %arg0, %c0_i32 : i32, i32
  }
}

</mosaic_0001>

<bundles_post_ra>
// kernel: tpu_custom_call.1
= control target key start
LH: loop header
LB: loop body
LE: loop exit
PB: predicated region body
PF: predicated region fallthrough
CT: control target
= control target key end

     0   :  { %13 = vsyncpa [#allocation3], 0  ;;  %s757_s0 = inlined_call_operand.hbm [shape: f32[8,16], index: 0, kind: input, shape index: {}]   ;;  %s758_s1 = inlined_call_operand.hbm [shape: f32[8,8], index: 1, kind: input, shape index: {}]   ;;  %s759_s2 = inlined_call_operand.hbm [shape: f32[16,256], index: 2, kind: input, shape index: {}]   ;;  %s760_s3 = inlined_call_operand.vmem [shape: f32[1,256], index: 3, kind: input, shape index: {}]   ;;  %s761_s4 = inlined_call_operand.vmem [shape: f32[8,128], index: 4, kind: input, shape index: {}]   ;;  %s762_s5 = inlined_call_operand.vmem [shape: f32[1,128], index: 5, kind: input, shape index: {}]   ;;  %s763_s6 = inlined_call_operand.hbm [shape: f32[128,128], index: 6, kind: input, shape index: {}]   ;;  %s764_s7 = inlined_call_operand.vmem [shape: f32[1,128], index: 7, kind: input, shape index: {}]   ;;  %s765_s8 = inlined_call_operand.hbm [shape: f32[8,128], index: 8, kind: output, shape index: {}]  }
   0x1   :  { %14 = vsyncpa [#allocation6], 0 }
   0x2   :  { %15 = vsyncpa [#allocation9], 0 }
   0x3   :  { %16 = vsyncpa [#allocation4], 0  ;;  %s626_s27 = smov [#allocation5]   ;;  %s627_s29 = smov [#allocation2]  }
   0x4   :  { %s33_s28 = sshll.u32 %s626_s27, 4  ;;  %s23_s30 = sshll.u32 %s627_s29, 4  ;;  %s34_s28 = int_to_ptr.vmem [resolvable:$true] %s33_s28  ;;  %s24_s30 = int_to_ptr.vmem [resolvable:$true] %s23_s30 }
   0x5   :  { %s508_s11 = scalar_lea.hbm %s758_s1, 128 }
   0x6   :  { %p509_p0 = scmp.ne.s32.totalorder %s758_s1, %s508_s11  ;;  %p512_p1 = scmp.lt.u32.totalorder %s508_s11, %s758_s1 }
   0x8   :  { %p514_p2 = pnand %p512_p1, %p509_p0 }
   0xa   :  { %517 = shalt.err (!%p514_p2)
}
   0xb   :  { %s518_s16 = scalar_lea.vmem %s34_s28, 128  ;;  %p523_p4 = scmp.lt.s32.totalorder %s34_s28, %s34_s28 }
   0xc   :  { %p519_p3 = scmp.ne.s32.totalorder %s34_s28, %s518_s16  ;;  %p524_p5 = scmp.lt.s32.totalorder %s518_s16, %s518_s16 }
   0xe   :  { %p525_p6 = por %p524_p5, %p523_p4 }
  0x10   :  { %p526_p7 = pnand %p525_p6, %p519_p3 }
  0x12   :  { %529 = shalt.err (!%p526_p7)
}
  0x13   :  { %36 = dma.hbm_to_vmem [thread:$0]  %s758_s1, 128, %s34_s28, [#allocation6]  }
  0x14   :  { %s530_s21 = scalar_lea.hbm %s757_s0, 128 }
  0x15   :  { %p531_p8 = scmp.ne.s32.totalorder %s757_s0, %s530_s21  ;;  %p534_p9 = scmp.lt.u32.totalorder %s530_s21, %s757_s0 }
  0x17   :  { %p536_p10 = pnand %p534_p9, %p531_p8 }
  0x19   :  { %539 = shalt.err (!%p536_p10)
}
  0x1a   :  { %s540_s26 = scalar_lea.vmem %s24_s30, 128  ;;  %p545_p12 = scmp.lt.s32.totalorder %s24_s30, %s24_s30 }
  0x1b   :  { %p541_p11 = scmp.ne.s32.totalorder %s24_s30, %s540_s26  ;;  %p546_p13 = scmp.lt.s32.totalorder %s540_s26, %s540_s26 }
  0x1d   :  { %p547_p0 = por %p546_p13, %p545_p12 }
  0x1f   :  { %p548_p1 = pnand %p547_p0, %p541_p11 }
  0x21   :  { %551 = shalt.err (!%p548_p1)
}
  0x22   :  { %26 = dma.hbm_to_vmem [thread:$0]  %s757_s0, 128, %s24_s30, [#allocation3]  }
  0x23   :  { %s628_s28 = smov [#allocation7]   ;;  %s552_s11 = scalar_lea.hbm %s759_s2, 512 }
  0x24   :  { %s42_s29 = sshll.u32 %s628_s28, 4  ;;  %p553_p2 = scmp.ne.s32.totalorder %s759_s2, %s552_s11  ;;  %s43_s29 = int_to_ptr.vmem [resolvable:$true] %s42_s29 }
  0x25   :  { %p556_p3 = scmp.lt.u32.totalorder %s552_s11, %s759_s2 }
  0x27   :  { %p558_p4 = pnand %p556_p3, %p553_p2 }
  0x29   :  { %561 = shalt.err (!%p558_p4)
}
  0x2a   :  { %s562_s16 = scalar_lea.vmem %s43_s29, 512  ;;  %p567_p6 = scmp.lt.s32.totalorder %s43_s29, %s43_s29 }
  0x2b   :  { %p563_p5 = scmp.ne.s32.totalorder %s43_s29, %s562_s16  ;;  %p568_p7 = scmp.lt.s32.totalorder %s562_s16, %s562_s16 }
  0x2d   :  { %p569_p8 = por %p568_p7, %p567_p6 }
  0x2f   :  { %p570_p9 = pnand %p569_p8, %p563_p5 }
  0x31   :  { %573 = shalt.err (!%p570_p9)
}
  0x32   :  { %s629_s0 = smov 256   ;;  %s630_s30 = smov 16  }
  0x33   :  { %48 = dma.hbm_to_vmem [thread:$0]  %s759_s2, 512, %s43_s29, [#allocation6], %s629_s0, %s629_s0, %s630_s30  }
  0x34   :  { %s631_s19 = smov [#allocation8]   ;;  %s574_s23 = scalar_lea.hbm %s763_s6, 2048 }
  0x35   :  { %s60_s20 = sshll.u32 %s631_s19, 4  ;;  %p575_p10 = scmp.ne.s32.totalorder %s763_s6, %s574_s23  ;;  %s61_s20 = int_to_ptr.vmem [resolvable:$true] %s60_s20 }
  0x36   :  { %p578_p11 = scmp.lt.u32.totalorder %s574_s23, %s763_s6 }
  0x38   :  { %p580_p12 = pnand %p578_p11, %p575_p10 }
  0x3a   :  { %583 = shalt.err (!%p580_p12)
}
  0x3b   :  { %s584_s27 = scalar_lea.vmem %s61_s20, 2048  ;;  %p589_p0 = scmp.lt.s32.totalorder %s61_s20, %s61_s20 }
  0x3c   :  { %p585_p13 = scmp.ne.s32.totalorder %s61_s20, %s584_s27  ;;  %p590_p1 = scmp.lt.s32.totalorder %s584_s27, %s584_s27 }
  0x3e   :  { %p591_p2 = por %p590_p1, %p589_p0 }
  0x40   :  { %p592_p3 = pnand %p591_p2, %p585_p13 }
  0x42   :  { %595 = shalt.err (!%p592_p3)
}
  0x43   :  { %s632_s2 = smov 128   ;;  %s633_s28 = smov 8  }
  0x44   :  { %66 = dma.hbm_to_vmem [thread:$0]  %s763_s6, 2048, %s61_s20, [#allocation9], %s632_s2, %s632_s2, %s633_s28  }
  0x45   :  { %618 = dma.done.wait [#allocation3], 128  }
  0x46   :  { %619 = vsyncadd [#allocation3], 4294967168 }
  0x47   :  { %620 = dma.done.wait [#allocation6], 640  }
  0x48   :  { %621 = vsyncadd [#allocation6], 4294966656 }
  0x49   :  { %622 = dma.done.wait [#allocation9], 2048  }
  0x4a   :  { %623 = vsyncadd [#allocation9], 4294965248  ;;  %v634_v0 = vmov 0.0   ;;  %vm635_vm0 = vmmov 0   ;;  %v83_v1 = vld [vmem:[#allocation7 + $0x8] sm:$0xff]  ;;  %v85_v2 = vld [vmem:[#allocation7 + $0x18] sm:$0xff]  ;;  %v88_v40 = vlaneseq }
  0x4b   :  { %166 = vmatprep.mubr.f32.mxu0 %v634_v0  ;;  %453 = vmatprep.mubr.msk.f32.mxu1 %vm635_vm0, %v634_v0  ;;  %v82_v3 = vld [vmem:[#allocation7] sm:$0xff]  ;;  %v456_v4 = vpack.c.bf16 %v85_v2, %v83_v1  ;;  %v84_v5 = vld [vmem:[#allocation7 + $0x10] sm:$0xff]  ;;  %v180_v7 = vld [vmem:[#allocation5] sm:$0xff]  ;;  %vm98_vm1 = vcmask 130048   ;;  %vm196_vm2 = vcmask 64512   ;;  %v636_v18 = vmov 0.0|0.0  }
  0x4c   :  { %v458_v6 = vpack.c.bf16 %v84_v5, %v82_v3  ;;  %v392_v8 = vmul.f32 -1.442695, %v180_v7  ;;  %v81_v9 = vld [vmem:[#allocation2] sm:$0xff]  ;;  %v271_v15 = vld [vmem:[#allocation8] sm:$0xff]  ;;  %v272_v16 = vld [vmem:[#allocation8 + $0x8] sm:$0xff]  ;;  %460 = vmatprep.subr.bf16.mxu1 %v636_v18  ;;  %v89_v41 = vshrl.u32 %v88_v40, 7 }
  0x4d   :  { %457 = vmatprep.subr.bf16.mxu0 %v456_v4  ;;  %v188_v10 = vld [vmem:[%s761_s4] sm:$0xff]  ;;  %v461_v17 = vpack.c.bf16 %v272_v16, %v271_v15  ;;  %v274_v20 = vld [vmem:[#allocation8 + $0x18] sm:$0xff]  ;;  %v275_v22 = vld [vmem:[#allocation8 + $0x20] sm:$0xff] }
  0x4e   :  { %459 = vmatpush1.bf16.msra.mxu0 %v458_v6  ;;  %496 = vpow2.f32 %v392_v8  ;;  %v273_v19 = vld [vmem:[#allocation8 + $0x10] sm:$0xff]  ;;  %v276_v23 = vld [vmem:[#allocation8 + $0x28] sm:$0xff]  ;;  %v278_v26 = vld [vmem:[#allocation8 + $0x38] sm:$0xff]  ;;  %v90_v42 = vsub.s32 0, %v89_v41  ;;  %v94_v1 = vsub.s32 1, %v89_v41 }
  0x4f   :  { %416 = vmatprep.subr.mxu0 %v634_v0  ;;  %462 = vmatpush3.bf16.msra.mxu1 %v461_v17  ;;  %v464_v21 = vpack.c.bf16 %v274_v20, %v273_v19  ;;  %v467_v24 = vpack.c.bf16 %v276_v23, %v275_v22  ;;  %v277_v25 = vld [vmem:[#allocation8 + $0x30] sm:$0xff]  ;;  %v279_v28 = vld [vmem:[#allocation8 + $0x40] sm:$0xff]  ;;  %v280_v29 = vld [vmem:[#allocation8 + $0x48] sm:$0xff] }
  0x50   :  { %463 = vmatprep.subr.bf16.mxu1 %v636_v18  ;;  %v470_v27 = vpack.c.bf16 %v278_v26, %v277_v25  ;;  %v473_v30 = vpack.c.bf16 %v280_v29, %v279_v28  ;;  %v281_v31 = vld [vmem:[#allocation8 + $0x50] sm:$0xff]  ;;  %v282_v32 = vld [vmem:[#allocation8 + $0x58] sm:$0xff]  ;;  %v283_v34 = vld [vmem:[#allocation8 + $0x60] sm:$0xff] }
  0x51   :  { %390 = vmatmul.mubr.msk.f32.vlgmr.msra.gmra.mrb[0].mxu0 %vm98_vm1, %v81_v9  ;;  %v476_v33 = vpack.c.bf16 %v282_v32, %v281_v31  ;;  %v284_v35 = vld [vmem:[#allocation8 + $0x68] sm:$0xff]  ;;  %v285_v37 = vld [vmem:[#allocation8 + $0x70] sm:$0xff]  ;;  %v286_v38 = vld [vmem:[#allocation8 + $0x78] sm:$0xff] }
  0x52   :  { %417 = vmatpush3.msra.mxu0 %v188_v10  ;;  %418 = vmatprep.mubr.msk.f32.mxu0 %vm635_vm0, %v634_v0  ;;  %v479_v36 = vpack.c.bf16 %v284_v35, %v283_v34  ;;  %v482_v39 = vpack.c.bf16 %v286_v38, %v285_v37  ;;  %v86_v43 = vld [vmem:[%s760_s3] sm:$0x3] }
  0x53   :  { %465 = vmatpush3.bf16.msra.mxu1 %v464_v21  ;;  %v91_v44 = vrot.slane %v86_v43, %v90_v42  ;;  %v393_v51 = vld [vmem:[%s762_s5] ss:$0 sm:$0xff]  ;;  %v95_v2 = vrot.slane %v86_v43, %v94_v1  ;;  %s637_s5 = smov [#allocation10]  }
  0x54   :  { %466 = vmatprep.subr.bf16.mxu1 %v636_v18  ;;  %v395_v58 = vld [vmem:[%s764_s7] ss:$0 sm:$0xff]  ;;  %s379_s15 = sshll.u32 %s637_s5, 4  ;;  %s380_s15 = int_to_ptr.vmem [resolvable:$true] %s379_s15 }
  0x55   :  { %s596_s16 = scalar_lea.vmem %s380_s15, 128  ;;  %p601_p5 = scmp.lt.s32.totalorder %s380_s15, %s380_s15 }
  0x56   :  { %p597_p4 = scmp.ne.s32.totalorder %s380_s15, %s596_s16  ;;  %p602_p6 = scmp.lt.s32.totalorder %s596_s16, %s596_s16 }
  0x57   :  { %468 = vmatpush3.bf16.msra.mxu1 %v467_v24 }
  0x58   :  { %v497_v11 = vpop.eup %496  ;;  %469 = vmatprep.subr.bf16.mxu1 %v636_v18  ;;  %p603_p7 = por %p602_p6, %p601_p5 }
  0x59   :  { %v184_v12 = vadd.f32 1.0, %v497_v11 }
  0x5a   :  { %p604_p8 = pnand %p603_p7, %p597_p4 }
  0x5b   :  { %498 = vrcp.f32 %v184_v12  ;;  %471 = vmatpush3.bf16.msra.mxu1 %v470_v27 }
  0x5c   :  { %472 = vmatprep.subr.bf16.mxu1 %v636_v18 }
  0x5f   :  { %474 = vmatpush3.bf16.msra.mxu1 %v473_v30 }
  0x60   :  { %475 = vmatprep.subr.bf16.mxu1 %v636_v18 }
  0x63   :  { %477 = vmatpush3.bf16.msra.mxu1 %v476_v33 }
  0x64   :  { %478 = vmatprep.subr.bf16.mxu1 %v636_v18 }
  0x65   :  { %v499_v13 = vpop.eup %498 }
  0x66   :  { %v187_v14 = vmul.f32 %v499_v13, %v180_v7 }
  0x67   :  { %480 = vmatpush3.bf16.msra.mxu1 %v479_v36 }
  0x68   :  { %419 = vmatmul.mubr.msk.f32.vlgmr.msra.gmra.mrb[2].mxu0 %vm196_vm2, %v187_v14  ;;  %481 = vmatprep.subr.bf16.mxu1 %v636_v18 }
  0x6b   :  { %483 = vmatpush3.bf16.msra.mxu1 %v482_v39 }
 0x124   :  { %v168_v45 = vpop.f32.mrb[0].mxu0 }
 0x125   :  { %v169_v46 = vadd.f32 %v168_v45, %v91_v44  ;;  %v170_v47 = vpop.f32.mrb[1].mxu0 }
 0x126   :  { %v171_v4 = vadd.f32 %v170_v47, %v95_v2 }
 0x127   :  { %v391_v48 = vmul.f32 -1.442695, %v169_v46 }
 0x129   :  { %500 = vpow2.f32 %v391_v48 }
 0x133   :  { %v501_v49 = vpop.eup %500 }
 0x134   :  { %v176_v50 = vadd.f32 1.0, %v501_v49 }
 0x136   :  { %502 = vrcp.f32 %v176_v50 }
 0x13b   :  { %v266_v52 = vpop.f32.mrb[2].mxu0 }
 0x13c   :  { %v420_v53 = vpop.f32.mrb[3].mxu0  ;;  %v267_v54 = vadd.f32 %v393_v51, %v266_v52 }
 0x140   :  { %v503_v55 = vpop.eup %502 }
 0x141   :  { %v179_v56 = vmul.f32 %v503_v55, %v169_v46 }
 0x143   :  { %v270_v57 = vadd.f32 %v267_v54, %v179_v56 }
 0x145   :  { %454 = vmatmul.mubr.f32.vlgmr.msra.gmra.mrb[0].mxu1 %v270_v57 }
 0x218   :  { %v360_v59 = vpop.f32.mrb[0].mxu1 }
 0x219   :  { %v361_v60 = vadd.f32 %v395_v58, %v360_v59  ;;  %v455_v61 = vpop.f32.mrb[1].mxu1 }
 0x21b   :  { %v396_v62 = vmul.f32 -1.442695, %v361_v60 }
 0x21d   :  { %504 = vpow2.f32 %v396_v62 }
 0x227   :  { %v505_v63 = vpop.eup %504 }
 0x228   :  { %v367_v0 = vadd.f32 1.0, %v505_v63 }
 0x22a   :  { %506 = vrcp.f32 %v367_v0 }
 0x234   :  { %v507_v3 = vpop.eup %506 }
 0x235   :  { %v370_v5 = vmul.f32 %v507_v3, %v361_v60 }
 0x237   :  { %v371_v6 = vadd.f32 %v370_v5, %v171_v4 }
 0x239   :  { %372 = vst [vmem:[#allocation10] sm:$0xff] %v371_v6 }
 0x23a   :  { %607 = shalt.err (!%p604_p8)
}
 0x23b   :  { %s608_s30 = scalar_lea.hbm %s765_s8, 128 }
 0x23c   :  { %p609_p9 = scmp.ne.s32.totalorder %s765_s8, %s608_s30  ;;  %p612_p10 = scmp.lt.u32.totalorder %s608_s30, %s765_s8 }
 0x23e   :  { %p614_p11 = pnand %p612_p10, %p609_p9 }
 0x240   :  { %617 = shalt.err (!%p614_p11)
}
 0x241   :  { %382 = dma.vmem_to_hbm [thread:$0]  %s380_s15, 128, %s765_s8, [#allocation4]  }
 0x242   :  { %624 = dma.done.wait [#allocation4], 128  }
 0x243   :  { %625 = vsyncadd [#allocation4], 4294967168 }
 0x244   :  { %386 = vsyncpa [#allocation3], 1 }
 0x245   :  { %387 = vsyncpa [#allocation6], 1 }
 0x246   :  { %388 = vsyncpa [#allocation9], 1 }
 0x247   :  { %389 = vsyncpa [#allocation4], 1 }

</bundles_post_ra>
